<compile_context>
chip_gen: v6e
topology: v6e:2x2x1
jax: 0.10.0
libtpu: 0.0.40
codegen_flags: <defaults>
</compile_context>

<pallas_src>
import functools

import jax
import jax.numpy as jnp
from jax import lax
from jax.experimental import pallas as pl
from jax.experimental.pallas import tpu as pltpu


_MASK_VALUE = -1e30  # finite "minus infinity": exp underflows to 0, no NaNs


def _cdiv(a, b):
    return (a + b - 1) // b


def _round_up(x, m):
    return _cdiv(x, m) * m


def _choose_tile(padded_base, base, cap):
    """Fewest tiles with tile <= cap; tile is a multiple of `base`.

    The caller pads the array up to n_tiles * tile (instead of shrinking the
    tile to an exact divisor), which avoids pathological tiny tiles (e.g. 640).
    Returns (tile, n_tiles).
    """
    cap = max(base, cap // base * base)
    n_tiles = _cdiv(padded_base, cap)
    tile = _round_up(_cdiv(padded_base, n_tiles), base)
    return tile, n_tiles


def _pad_to(x, shape):
    pads = [(0, t - s) for s, t in zip(x.shape, shape)]
    if all(p == (0, 0) for p in pads):
        return x
    return jnp.pad(x, pads)


def _flash_attention_kernel(q_ref, k_ref, v_ref, bias_ref, o_ref,
                            qs_scr, m_scr, l_scr, acc_scr,
                            *, mask_future, tq, tk, scale):
    qi = pl.program_id(1)
    kv = pl.program_id(2)
    n_kv = pl.num_programs(2)

    @pl.when(kv == 0)
    def _init():
        # q block is resident across the kv axis: apply 1/sqrt(d) and the bf16
        # cast once per (b, q-tile) instead of once per kv step.
        qv = q_ref[0]
        qs_scr[...] = (qv * jnp.asarray(scale, qv.dtype)).astype(qs_scr.dtype)
        m_scr[...] = jnp.full(m_scr.shape, _MASK_VALUE, jnp.float32)
        l_scr[...] = jnp.zeros(l_scr.shape, jnp.float32)
        acc_scr[...] = jnp.zeros(acc_scr.shape, jnp.float32)

    def _compute(apply_causal_mask):
        q = qs_scr[...]                                    # (tq, d) bf16, pre-scaled
        k = k_ref[0].astype(jnp.bfloat16)                  # (tk, d) bf16 for the MXU

        # q @ k^T without an explicit transpose: contract last dims on the MXU,
        # accumulating in f32.
        s = lax.dot_general(
            q, k,
            dimension_numbers=(((1,), (1,)), ((), ())),
            preferred_element_type=jnp.float32)            # (tq, tk) f32

        # Key-padding / attn_mask as a finite additive bias; the whole padded
        # bias row lives in VMEM, slice the tk window (no per-step bias DMA).
        col0 = pl.multiple_of(kv * tk, 128)
        s = s + bias_ref[0, :, pl.ds(col0, tk)]            # (1, tk) broadcast

        if apply_causal_mask:
            row = qi * tq + lax.broadcasted_iota(jnp.int32, (tq, tk), 0)
            col = kv * tk + lax.broadcasted_iota(jnp.int32, (tq, tk), 1)
            s = jnp.where(col <= row, s, _MASK_VALUE)

        # Online-softmax update; f32 math (safe on v5e's non-bf16 VPU/EUP).
        m_prev = m_scr[...]                                # (tq, 1)
        m_new = jnp.maximum(m_prev, jnp.max(s, axis=-1, keepdims=True))
        alpha = jnp.exp(m_prev - m_new)
        p = jnp.exp(s - m_new)                             # (tq, tk)

        l_scr[...] = alpha * l_scr[...] + jnp.sum(p, axis=-1, keepdims=True)
        acc_scr[...] = alpha * acc_scr[...] + jnp.dot(
            p.astype(jnp.bfloat16), v_ref[0].astype(jnp.bfloat16),
            preferred_element_type=jnp.float32)
        m_scr[...] = m_new

    if mask_future:
        tile_lo = kv * tk                 # first key column in this kv tile
        tile_hi = kv * tk + (tk - 1)      # last key column
        row_lo = qi * tq                  # first query row in this q tile
        row_hi = qi * tq + (tq - 1)       # last query row

        # Fully-visible tiles: skip the O(tq*tk) iota/compare/select.
        @pl.when(tile_hi <= row_lo)
        def _fully_visible():
            _compute(apply_causal_mask=False)

        # Diagonal-straddling tiles: apply the causal mask.
        @pl.when(jnp.logical_and(tile_hi > row_lo, tile_lo <= row_hi))
        def _straddling():
            _compute(apply_causal_mask=True)
        # Fully-masked tiles (tile_lo > row_hi) are skipped entirely; the
        # clamped k/v index_maps suppress their DMAs as well.
    else:
        _compute(apply_causal_mask=False)

    @pl.when(kv == n_kv - 1)
    def _finalize():
        inv_l = pl.reciprocal(l_scr[...], approx=True)     # EUP vrcp, off the VALU
        o_ref[0] = (acc_scr[...] * inv_l).astype(o_ref.dtype)


def attention(q, k, v, attn_mask, *, mask_future=False, tq_max=512, tk_max=1024):
    """Pallas-TPU equivalent of Attention.forward."""
    B, n_q, d = q.shape
    _, n_k, d_v = v.shape
    assert k.shape == (B, n_k, d)
    assert attn_mask.shape == (B, n_k)

    # Sublane pack for the q/out rows depends on dtype (8 f32 / 16 bf16 / 32 i8).
    q_base = {4: 8, 2: 16, 1: 32}.get(jnp.dtype(q.dtype).itemsize, 8)

    d_pad = _round_up(d, 128)
    d_v_pad = _round_up(d_v, 128)

    # --- q tiling: fewest, largest tiles <= tq_max (pad up, don't shrink).
    n_q_base = _round_up(n_q, q_base)
    tq, n_q_tiles = _choose_tile(n_q_base, q_base, tq_max)
    # v7x has 2 TensorCores: expose >= 2 units of work on the parallel axes.
    if B * n_q_tiles < 2 and n_q_base >= 2 * q_base:
        n_q_tiles = 2
        tq = _round_up(_cdiv(n_q_base, n_q_tiles), q_base)
    n_q_pad = n_q_tiles * tq

    # --- kv tiling: large tiles amortize the ~0.35us per-grid-step overhead.
    n_k_base = _round_up(n_k, 128)
    tk, n_k_tiles = _choose_tile(n_k_base, 128, tk_max)
    if tk >= 256:
        tk = _round_up(tk, 256)       # fill the 256-wide MXU on v6e/v7x
    n_k_pad = n_k_tiles * tk

    q_p = _pad_to(q, (B, n_q_pad, d_pad))
    k_p = _pad_to(k, (B, n_k_pad, d_pad))
    v_p = _pad_to(v, (B, n_k_pad, d_v_pad))

    # 0/1 mask -> finite additive bias; padded keys are masked too.
    mask_p = _pad_to(attn_mask.astype(jnp.float32), (B, n_k_pad))
    bias = jnp.where(mask_p != 0, 0.0, _MASK_VALUE).astype(jnp.float32)
    bias = bias.reshape(B, 1, n_k_pad)

    scale = float(d) ** -0.5

    if mask_future:
        # Clamp the kv block index for tiles fully above the causal diagonal so
        # the skipped steps re-use the previous block -> no dead K/V DMA.
        def kv_index(b, qi, kv):
            last_kv = (qi * tq + (tq - 1)) // tk
            return (b, jnp.minimum(kv, last_kv), 0)
    else:
        def kv_index(b, qi, kv):
            return (b, kv, 0)

    kernel = functools.partial(
        _flash_attention_kernel,
        mask_future=mask_future, tq=tq, tk=tk, scale=scale)

    grid = (B, n_q_pad // tq, n_k_pad // tk)

    # VMEM budget: double-buffered blocks + scratch, x2 headroom, capped well
    # below v7x's 64 MiB physical VMEM.
    itemsize = jnp.dtype(q.dtype).itemsize
    vmem_bytes = (
        2 * tq * d_pad * itemsize                  # q block
        + 2 * tk * d_pad * k_p.dtype.itemsize      # k block
        + 2 * tk * d_v_pad * v_p.dtype.itemsize    # v block
        + 2 * n_k_pad * 4                          # bias row
        + 2 * tq * d_v_pad * itemsize              # out block
        + tq * d_pad * 2                           # pre-scaled q scratch (bf16)
        + tq * d_v_pad * 4                         # acc scratch
        + 4 * tq * 4)                              # m, l scratch
    vmem_limit = int(min(max(32 << 20, 2 * vmem_bytes), 48 << 20))

    out = pl.pallas_call(
        kernel,
        out_shape=jax.ShapeDtypeStruct((B, n_q_pad, d_v_pad), q.dtype),
        grid_spec=pltpu.PrefetchScalarGridSpec(
            num_scalar_prefetch=0,
            grid=grid,
            in_specs=[
                pl.BlockSpec((1, tq, d_pad), lambda b, qi, kv: (b, qi, 0)),
                pl.BlockSpec((1, tk, d_pad), kv_index),
                pl.BlockSpec((1, tk, d_v_pad), kv_index),
                pl.BlockSpec((1, 1, n_k_pad), lambda b, qi, kv: (b, 0, 0)),
            ],
            out_specs=pl.BlockSpec((1, tq, d_v_pad), lambda b, qi, kv: (b, qi, 0)),
            scratch_shapes=[
                pltpu.VMEM((tq, d_pad), jnp.bfloat16),   # pre-scaled q (bf16)
                pltpu.VMEM((tq, 1), jnp.float32),        # running max m
                pltpu.VMEM((tq, 1), jnp.float32),        # running denom l
                pltpu.VMEM((tq, d_v_pad), jnp.float32),  # output accumulator
            ],
        ),
        compiler_params=pltpu.CompilerParams(
            dimension_semantics=("parallel", "parallel", "arbitrary"),
            vmem_limit_bytes=vmem_limit),
    )(q_p, k_p, v_p, bias)

    return out[:, :n_q, :d_v]


def _reference(q, k, v, attn_mask, *, mask_future=False):
    # Plain-JAX reference mirroring the PyTorch semantics.
    d = q.shape[-1]
    n_q, n_k = q.shape[1], k.shape[1]
    logits = jnp.einsum("bqd,bkd->bqk", q, k) / jnp.sqrt(jnp.float32(d))
    if mask_future:
        tril = jnp.tril(jnp.ones((n_q, n_k)))
        logits = jnp.where(tril == 0, -jnp.inf, logits)
    logits = jnp.where(attn_mask[:, None, :] == 0, -jnp.inf, logits)
    w = jax.nn.softmax(logits, axis=-1)
    return jnp.einsum("bqk,bkd->bqd", w, v)


if __name__ == "__main__":
    key = jax.random.PRNGKey(0)
    kq, kk, kvk, km = jax.random.split(key, 4)

    # Small shapes consistent with the module.
    B, n_q, n_k, d, d_v = 2, 8, 8, 32, 32
    q = jax.random.normal(kq, (B, n_q, d), dtype=jnp.float32)
    k = jax.random.normal(kk, (B, n_k, d), dtype=jnp.float32)
    v = jax.random.normal(kvk, (B, n_k, d_v), dtype=jnp.float32)
    # 0/1 mask; guarantee at least the first key is visible per batch.
    attn_mask = (jax.random.uniform(km, (B, n_k)) > 0.3).astype(jnp.float32)
    attn_mask = attn_mask.at[:, 0].set(1.0)

    # bf16 MXU operands (f32 accumulation) -> slightly looser tolerance than f32.
    tol = dict(atol=2e-2, rtol=2e-2)

    for mf in (False, True):
        out = jax.block_until_ready(attention(q, k, v, attn_mask, mask_future=mf))
        ref = _reference(q, k, v, attn_mask, mask_future=mf)
        assert out.shape == ref.shape
        assert jnp.allclose(out, ref, **tol), (
            f"mismatch vs reference (mask_future={mf})")

    # Larger shape: multiple q / kv tiles -> online-softmax carry, causal
    # tile skip + clamped index_maps, default (large) tiles.  grid = (2, 2, 2).
    kq2, kk2, kv2, km2 = jax.random.split(jax.random.PRNGKey(1), 4)
    B2, n_q2, n_k2, d2, d_v2 = 2, 1024, 2048, 64, 128
    q2 = jax.random.normal(kq2, (B2, n_q2, d2), dtype=jnp.float32)
    k2 = jax.random.normal(kk2, (B2, n_k2, d2), dtype=jnp.float32)
    v2 = jax.random.normal(kv2, (B2, n_k2, d_v2), dtype=jnp.float32)
    m2 = (jax.random.uniform(km2, (B2, n_k2)) > 0.2).astype(jnp.float32)
    m2 = m2.at[:, 0].set(1.0)

    for mf in (False, True):
        out2 = jax.block_until_ready(attention(q2, k2, v2, m2, mask_future=mf))
        ref2 = _reference(q2, k2, v2, m2, mask_future=mf)
        assert jnp.allclose(out2, ref2, **tol), (
            f"mismatch vs reference, large shape (mask_future={mf})")

    # Smaller explicit tiles on the causal path: exercises all three causal
    # regimes (fully-visible / diagonal-straddling / skipped).  grid = (2, 4, 4).
    out3 = jax.block_until_ready(
        attention(q2, k2, v2, m2, mask_future=True, tq_max=256, tk_max=512))
    ref3 = _reference(q2, k2, v2, m2, mask_future=True)
    assert jnp.allclose(out3, ref3, **tol), "mismatch vs reference, small-tile causal"

    print("KERNEL_OK")
</pallas_src>

<mosaic_0001>
module attributes {stable_mosaic.version = 11 : i64} {
  func.func @_flash_attention_kernel(%arg0: i32, %arg1: i32, %arg2: i32, %arg3: memref<1x8x128xf32, #tpu.memory_space<vmem>>, %arg4: memref<1x128x128xf32, #tpu.memory_space<vmem>>, %arg5: memref<1x128x128xf32, #tpu.memory_space<vmem>>, %arg6: memref<1x1x128xf32, #tpu.memory_space<vmem>>, %arg7: memref<1x8x128xf32, #tpu.memory_space<vmem>>, %arg8: memref<8x128xbf16, #tpu.memory_space<vmem>>, %arg9: memref<8x1xf32, #tpu.memory_space<vmem>>, %arg10: memref<8x1xf32, #tpu.memory_space<vmem>>, %arg11: memref<8x128xf32, #tpu.memory_space<vmem>>) attributes {dimension_semantics = [#tpu.dimension_semantics<parallel>, #tpu.dimension_semantics<parallel>, #tpu.dimension_semantics<arbitrary>], iteration_bounds = array<i64: 2, 1, 1>, scalar_prefetch = 0 : i64, scratch_operands = 4 : i64, tpu.core_type = #tpu.core_type<tc>, window_params = [{transform_indices = @transform_0, window_bounds = array<i64: 1, 8, 128>}, {transform_indices = @transform_1, window_bounds = array<i64: 1, 128, 128>}, {transform_indices = @transform_2, window_bounds = array<i64: 1, 128, 128>}, {transform_indices = @transform_3, window_bounds = array<i64: 1, 1, 128>}, {transform_indices = @transform_4, window_bounds = array<i64: 1, 8, 128>}]} {
    %c0_i32 = arith.constant 0 : i32
    %0 = arith.cmpi eq, %arg2, %c0_i32 : i32
    %1 = arith.extui %0 : i1 to i32
    %c0_i32_0 = arith.constant 0 : i32
    %2 = arith.cmpi ne, %1, %c0_i32_0 : i32
    scf.if %2 {
      %c0_27 = arith.constant 0 : index
      %c0_28 = arith.constant 0 : index
      %c0_29 = arith.constant 0 : index
      %44 = vector.load %arg3[%c0_27, %c0_28, %c0_29] : memref<1x8x128xf32, #tpu.memory_space<vmem>>, vector<1x8x128xf32>
      %45 = vector.shape_cast %44 : vector<1x8x128xf32> to vector<8x128xf32>
      %cst_30 = arith.constant 0.176776692 : f32
      %46 = vector.broadcast %cst_30 : f32 to vector<8x128xf32>
      %47 = arith.mulf %45, %46 : vector<8x128xf32>
      %48 = arith.truncf %47 : vector<8x128xf32> to vector<8x128xbf16>
      %c0_31 = arith.constant 0 : index
      %c0_32 = arith.constant 0 : index
      %49 = vector.load %arg8[%c0_31, %c0_32] : memref<8x128xbf16, #tpu.memory_space<vmem>>, vector<8x128xbf16>
      tpu.vector_store %arg8[%c0_31, %c0_32], %48 {strides = array<i32>} : memref<8x128xbf16, #tpu.memory_space<vmem>>, vector<8x128xbf16>,
      %cst_33 = arith.constant -1.000000e+30 : f32
      %50 = vector.broadcast %cst_33 : f32 to vector<8x1xf32>
      %c0_34 = arith.constant 0 : index
      %c0_35 = arith.constant 0 : index
      %51 = vector.load %arg9[%c0_34, %c0_35] : memref<8x1xf32, #tpu.memory_space<vmem>>, vector<8x1xf32>
      tpu.vector_store %arg9[%c0_34, %c0_35], %50 {strides = array<i32>} : memref<8x1xf32, #tpu.memory_space<vmem>>, vector<8x1xf32>,
      %cst_36 = arith.constant 0.000000e+00 : f32
      %52 = vector.broadcast %cst_36 : f32 to vector<8x1xf32>
      %c0_37 = arith.constant 0 : index
      %c0_38 = arith.constant 0 : index
      %53 = vector.load %arg10[%c0_37, %c0_38] : memref<8x1xf32, #tpu.memory_space<vmem>>, vector<8x1xf32>
      tpu.vector_store %arg10[%c0_37, %c0_38], %52 {strides = array<i32>} : memref<8x1xf32, #tpu.memory_space<vmem>>, vector<8x1xf32>,
      %cst_39 = arith.constant 0.000000e+00 : f32
      %54 = vector.broadcast %cst_39 : f32 to vector<8x128xf32>
      %c0_40 = arith.constant 0 : index
      %c0_41 = arith.constant 0 : index
      %55 = vector.load %arg11[%c0_40, %c0_41] : memref<8x128xf32, #tpu.memory_space<vmem>>, vector<8x128xf32>
      tpu.vector_store %arg11[%c0_40, %c0_41], %54 {strides = array<i32>} : memref<8x128xf32, #tpu.memory_space<vmem>>, vector<8x128xf32>,
    } else {
    }
    %c0 = arith.constant 0 : index
    %c0_1 = arith.constant 0 : index
    %3 = vector.load %arg8[%c0, %c0_1] : memref<8x128xbf16, #tpu.memory_space<vmem>>, vector<8x128xbf16>
    %c0_2 = arith.constant 0 : index
    %c0_3 = arith.constant 0 : index
    %c0_4 = arith.constant 0 : index
    %4 = vector.load %arg4[%c0_2, %c0_3, %c0_4] : memref<1x128x128xf32, #tpu.memory_space<vmem>>, vector<1x128x128xf32>
    %5 = vector.shape_cast %4 : vector<1x128x128xf32> to vector<128x128xf32>
    %6 = arith.truncf %5 : vector<128x128xf32> to vector<128x128xbf16>
    %cst = arith.constant dense<0.000000e+00> : vector<8x128xf32>
    %7 = tpu.matmul %3, %6, %cst {dimension_numbers = #tpu.dot_dimension_numbers<[1], [1], [0], [0], [0, 0, 1, 0], [], []>} : vector<8x128xbf16>, vector<128x128xbf16>, vector<8x128xf32> -> vector<8x128xf32>
    %c128_i32 = arith.constant 128 : i32
    %8 = arith.muli %arg2, %c128_i32 : i32
    %9 = tpu.assume_multiple %8, 128 : i32
    %c0_5 = arith.constant 0 : index
    %c0_6 = arith.constant 0 : index
    %10 = arith.index_cast %9 : i32 to index
    %11 = vector.load %arg6[%c0_5, %c0_6, %10] : memref<1x1x128xf32, #tpu.memory_space<vmem>>, vector<1x1x128xf32>
    %12 = vector.shape_cast %11 : vector<1x1x128xf32> to vector<1x128xf32>
    %13 = vector.broadcast %12 : vector<1x128xf32> to vector<8x128xf32>
    %14 = arith.addf %7, %13 : vector<8x128xf32>
    %c0_7 = arith.constant 0 : index
    %c0_8 = arith.constant 0 : index
    %15 = vector.load %arg9[%c0_7, %c0_8] : memref<8x1xf32, #tpu.memory_space<vmem>>, vector<8x1xf32>
    %cst_9 = arith.constant dense<0xFF800000> : vector<8xf32>
    %16 = vector.multi_reduction <maximumf>, %14, %cst_9 [1] : vector<8x128xf32> to vector<8xf32>
    %17 = vector.shape_cast %16 : vector<8xf32> to vector<8x1xf32>
    %18 = arith.maximumf %15, %17 : vector<8x1xf32>
    %19 = arith.subf %15, %18 : vector<8x1xf32>
    %20 = math.exp %19 : vector<8x1xf32>
    %21 = vector.broadcast %18 : vector<8x1xf32> to vector<8x128xf32>
    %22 = arith.subf %14, %21 : vector<8x128xf32>
    %23 = math.exp %22 : vector<8x128xf32>
    %c0_10 = arith.constant 0 : index
    %c0_11 = arith.constant 0 : index
    %24 = vector.load %arg10[%c0_10, %c0_11] : memref<8x1xf32, #tpu.memory_space<vmem>>, vector<8x1xf32>
    %25 = arith.mulf %20, %24 : vector<8x1xf32>
    %cst_12 = arith.constant dense<0.000000e+00> : vector<8xf32>
    %26 = vector.multi_reduction <add>, %23, %cst_12 [1] : vector<8x128xf32> to vector<8xf32>
    %27 = vector.shape_cast %26 : vector<8xf32> to vector<8x1xf32>
    %28 = arith.addf %25, %27 : vector<8x1xf32>
    %c0_13 = arith.constant 0 : index
    %c0_14 = arith.constant 0 : index
    %29 = vector.load %arg10[%c0_13, %c0_14] : memref<8x1xf32, #tpu.memory_space<vmem>>, vector<8x1xf32>
    tpu.vector_store %arg10[%c0_13, %c0_14], %28 {strides = array<i32>} : memref<8x1xf32, #tpu.memory_space<vmem>>, vector<8x1xf32>,
    %c0_15 = arith.constant 0 : index
    %c0_16 = arith.constant 0 : index
    %30 = vector.load %arg11[%c0_15, %c0_16] : memref<8x128xf32, #tpu.memory_space<vmem>>, vector<8x128xf32>
    %31 = vector.broadcast %20 : vector<8x1xf32> to vector<8x128xf32>
    %32 = arith.mulf %31, %30 : vector<8x128xf32>
    %33 = arith.truncf %23 : vector<8x128xf32> to vector<8x128xbf16>
    %c0_17 = arith.constant 0 : index
    %c0_18 = arith.constant 0 : index
    %c0_19 = arith.constant 0 : index
    %34 = vector.load %arg5[%c0_17, %c0_18, %c0_19] : memref<1x128x128xf32, #tpu.memory_space<vmem>>, vector<1x128x128xf32>
    %35 = vector.shape_cast %34 : vector<1x128x128xf32> to vector<128x128xf32>
    %36 = arith.truncf %35 : vector<128x128xf32> to vector<128x128xbf16>
    %cst_20 = arith.constant dense<0.000000e+00> : vector<8x128xf32>
    %37 = tpu.matmul %33, %36, %cst_20 {dimension_numbers = #tpu.dot_dimension_numbers<[1], [0], [0], [1], [0, 0, 1, 1], [], []>} : vector<8x128xbf16>, vector<128x128xbf16>, vector<8x128xf32> -> vector<8x128xf32>
    %38 = arith.addf %32, %37 : vector<8x128xf32>
    %c0_21 = arith.constant 0 : index
    %c0_22 = arith.constant 0 : index
    %39 = vector.load %arg11[%c0_21, %c0_22] : memref<8x128xf32, #tpu.memory_space<vmem>>, vector<8x128xf32>
    tpu.vector_store %arg11[%c0_21, %c0_22], %38 {strides = array<i32>} : memref<8x128xf32, #tpu.memory_space<vmem>>, vector<8x128xf32>,
    %c0_23 = arith.constant 0 : index
    %c0_24 = arith.constant 0 : index
    %40 = vector.load %arg9[%c0_23, %c0_24] : memref<8x1xf32, #tpu.memory_space<vmem>>, vector<8x1xf32>
    tpu.vector_store %arg9[%c0_23, %c0_24], %18 {strides = array<i32>} : memref<8x1xf32, #tpu.memory_space<vmem>>, vector<8x1xf32>,
    %c0_i32_25 = arith.constant 0 : i32
    %41 = arith.cmpi eq, %arg2, %c0_i32_25 : i32
    %42 = arith.extui %41 : i1 to i32
    %c0_i32_26 = arith.constant 0 : i32
    %43 = arith.cmpi ne, %42, %c0_i32_26 : i32
    scf.if %43 {
      %c0_27 = arith.constant 0 : index
      %c0_28 = arith.constant 0 : index
      %44 = vector.load %arg10[%c0_27, %c0_28] : memref<8x1xf32, #tpu.memory_space<vmem>>, vector<8x1xf32>
      %45 = tpu.reciprocal %44 {approx = true} : vector<8x1xf32> -> vector<8x1xf32>
      %c0_29 = arith.constant 0 : index
      %c0_30 = arith.constant 0 : index
      %46 = vector.load %arg11[%c0_29, %c0_30] : memref<8x128xf32, #tpu.memory_space<vmem>>, vector<8x128xf32>
      %47 = vector.broadcast %45 : vector<8x1xf32> to vector<8x128xf32>
      %48 = arith.mulf %46, %47 : vector<8x128xf32>
      %c0_31 = arith.constant 0 : index
      %c0_32 = arith.constant 0 : index
      %c0_33 = arith.constant 0 : index
      %49 = vector.load %arg7[%c0_31, %c0_32, %c0_33] : memref<1x8x128xf32, #tpu.memory_space<vmem>>, vector<1x8x128xf32>
      %50 = vector.shape_cast %49 : vector<1x8x128xf32> to vector<8x128xf32>
      %51 = vector.shape_cast %48 : vector<8x128xf32> to vector<1x8x128xf32>
      tpu.vector_store %arg7[%c0_31, %c0_32, %c0_33], %51 {strides = array<i32>} : memref<1x8x128xf32, #tpu.memory_space<vmem>>, vector<1x8x128xf32>,
    } else {
    }
    return
  }
  func.func @transform_0(%arg0: i32, %arg1: i32, %arg2: i32) -> (i32, i32, i32) {
    %c0_i32 = arith.constant 0 : i32
    %c0_i32_0 = arith.constant 0 : i32
    return %arg0, %arg1, %c0_i32 : i32, i32, i32
  }
  func.func @transform_1(%arg0: i32, %arg1: i32, %arg2: i32) -> (i32, i32, i32) {
    %c0_i32 = arith.constant 0 : i32
    %c0_i32_0 = arith.constant 0 : i32
    return %arg0, %arg2, %c0_i32 : i32, i32, i32
  }
  func.func @transform_2(%arg0: i32, %arg1: i32, %arg2: i32) -> (i32, i32, i32) {
    %c0_i32 = arith.constant 0 : i32
    %c0_i32_0 = arith.constant 0 : i32
    return %arg0, %arg2, %c0_i32 : i32, i32, i32
  }
  func.func @transform_3(%arg0: i32, %arg1: i32, %arg2: i32) -> (i32, i32, i32) {
    %c0_i32 = arith.constant 0 : i32
    %c0_i32_0 = arith.constant 0 : i32
    %c0_i32_1 = arith.constant 0 : i32
    return %arg0, %c0_i32, %c0_i32_0 : i32, i32, i32
  }
  func.func @transform_4(%arg0: i32, %arg1: i32, %arg2: i32) -> (i32, i32, i32) {
    %c0_i32 = arith.constant 0 : i32
    %c0_i32_0 = arith.constant 0 : i32
    return %arg0, %arg1, %c0_i32 : i32, i32, i32
  }
}

</mosaic_0001>

<bundles_post_ra>
// kernel: tpu_custom_call.1
= control target key start
LH: loop header
LB: loop body
LE: loop exit
PB: predicated region body
PF: predicated region fallthrough
CT: control target
= control target key end

     0   :  { %s1334_s0 = inlined_call_operand.hbm [shape: f32[2,8,128], index: 0, kind: input, shape index: {}]   ;;  %s1335_s1 = inlined_call_operand.hbm [shape: f32[2,128,128], index: 1, kind: input, shape index: {}]   ;;  %s1336_s2 = inlined_call_operand.hbm [shape: f32[2,128,128], index: 2, kind: input, shape index: {}]   ;;  %s1337_s3 = inlined_call_operand.vmem [shape: f32[2,1,128], index: 3, kind: input, shape index: {}]   ;;  %s1338_s4 = inlined_call_operand.hbm [shape: f32[2,8,128], index: 4, kind: output, shape index: {}]  }
   0x1   :  { %1343 = sst [smem:[#allocation20_spill]] %s1335_s1 }
   0x2   :  { %9 = vsyncpa [#allocation7], 0 }
   0x3   :  { %11 = vsyncpa [#allocation7 + $0x1], 0 }
   0x4   :  { %12 = vsyncpa [#allocation10], 0 }
   0x5   :  { %14 = vsyncpa [#allocation10 + $0x1], 0 }
   0x6   :  { %15 = vsyncpa [#allocation8], 0 }
   0x7   :  { %17 = vsyncpa [#allocation8 + $0x1], 0  ;;  %s1067_s15 = smov 0   ;;  %s1069_s16 = smov 0  }
   0x8   :  { %s1071_s17 = smov 0   ;;  %s1073_s18 = smov 0  }
   0x9   :  { %s1075_s19 = smov 0   ;;  %s1077_s20 = smov 0  }
   0xa LB: > { %1344 = sst [smem:[#allocation16_spill]] %s1018_s17  ;;  %s1098_s21 = sadd.s32 4294967295, %s1030_s20   ;;  %s1030_s20 = sphi %s1077_s20, %s23_s20   ;;  %s1026_s19 = sphi %s1075_s19, %s1364_s19   ;;  %s1022_s18 = sphi %s1073_s18, %s1363_s18   ;;  %s1018_s17 = sphi %s1071_s17, %s1359_s17   ;;  %s1014_s16 = sphi %s1069_s16, %s1362_s16   ;;  %s1010_s15 = sphi %s1067_s15, %s1361_s15  }
   0xb   : > { %s695_s22 = sadd.s32 4294967294, %s1030_s20   ;;  %s42_s23 = sadd.s32 1, %s1026_s19 }
   0xc   : > { %s51_s24 = sadd.s32 1, %s1018_s17  ;;  %p44_p0 = scmp.ge.s32.totalorder %s42_s23, 2 }
   0xd   : > { %p58_p1 = scmp.ne.s32.totalorder %s1018_s17, %s1014_s16  ;;  %p59_p2 = scmp.eq.s32.totalorder %s1030_s20, 0 }
   0xe   : > { %p64_p3 = scmp.ne.s32.totalorder %s1014_s16, %s1010_s15  ;;  %s1366_s23 = smov (%p44_p0, %s42_s23), 0 }
   0xf   : > { %1345 = sst [smem:[#allocation17_spill]] %s1366_s23  ;;  %p1110_p4 = por %p59_p2, %p58_p1 }
  0x10   : > { %p65_p5 = scmp.eq.s32.totalorder %s1098_s21, 0  ;;  %s46_s26 = ssub.s32 %s1026_s19, %s1366_s23 }
  0x11   : > { %p172_p6 = scmp.eq.s32.totalorder %s1098_s21, 1  ;;  %p49_p7 = scmp.eq.s32.totalorder %s46_s26, 0 }
  0x12   : > { %p1118_p8 = por %p65_p5, %p64_p3  ;;  %p178_p10 = scmp.eq.s32.totalorder %s695_s22, 1 }
  0x13   : > { %p1122_p9 = por %p172_p6, %p58_p1  ;;  %p798_p13 = scmp.lt.s32.totalorder %s1030_s20, 2 }
  0x14   : > { %s1127_s29 = scalar_select %p49_p7, %s1018_s17, %s51_s24  }
  0x15   : > { %p1129_p11 = por %p178_p10, %p64_p3  ;;  %s1136_s5 = sand.u32 1, %s1018_s17  }
  0x16   : > { %1349 = sst [smem:[#allocation18_spill]] %s1127_s29  ;;  %s217_s6 = sand.u32 1, %s1030_s20  }
  0x17   : > { %s1350_s30 = scalar_select %p1129_p11, 1, 0 }
  0x18   : > { %s700_s7 = sshll.u32 %s1136_s5, 7  ;;  %p1142_p0 = pnand %p798_p13, %p1110_p4 }
  0x19   : > { %1351 = sst [smem:[#allocation19_spill]] %s1350_s30  ;;  %s716_s9 = sshll.u32 %s1026_s19, 11 }
  0x1a   : > { %s1353_s1 = sld [smem:[#allocation20_spill]]  ;;  %s221_s13 = scalar_lea.vmem [#allocation9], %s700_s7 }
  0x1b   : > { %s230_s14 = sshll.u32 %s221_s13, 4  ;;  %s1152_s22 = scalar_lea.sflag [#allocation10], %s217_s6  ;;  %s231_s14 = int_to_ptr.vmem [resolvable:$true] %s230_s14 }
  0x1c   : > { %p864_p1 = pneg %p1142_p0  ;;  %s875_s24 = scalar_lea.vmem %s231_s14, 2048 }
  0x1d   : > { %p876_p2 = scmp.ne.s32.totalorder %s231_s14, %s875_s24  ;;  %s1032_s25 = smov [#allocation9]  }
  0x1e   : > { %s880_s26 = sshll.u32 %s1032_s25, 4  ;;  %s881_s26 = int_to_ptr.vmem [resolvable:$false] %s880_s26 }
  0x1f   : > { %p878_p3 = pnand %p876_p2, %p864_p1  ;;  %s882_s23 = scalar_lea.vmem %s881_s26, 4096 }
  0x20   : > { %s229_s12 = scalar_lea.hbm %s1353_s1, %s716_s9  ;;  %p883_p5 = scmp.lt.s32.totalorder %s231_s14, %s881_s26 }
  0x21   : > { %p879_p4 = pneg %p878_p3  ;;  %p884_p6 = scmp.lt.s32.totalorder %s882_s23, %s875_s24 }
  0x23   : > { %p885_p7 = por %p884_p6, %p883_p5 }
  0x25   : > { %p886_p10 = pnand %p885_p7, %p879_p4 }
  0x27   : > { %889 = shalt.err (!%p886_p10)
}
  0x28   : > { %s1342_s10 = smov 128   ;;  %s1034_s6 = smov 8  }
  0x29   : > { %790 = dma.hbm_to_vmem [thread:$0]  (!%p1142_p0), %s229_s12, 2048, %s231_s14, %s1152_s22, %s1342_s10, %s1342_s10, %s1034_s6  }
  0x2a   : > { %s1168_s13 = scalar_lea.hbm %s1336_s2, %s716_s9  ;;  %p706_p13 = scmp.ge.s32.totalorder %s1030_s20, 1 }
  0x2b   : > { %s244_s24 = scalar_lea.vmem [#allocation11], %s700_s7  ;;  %p267_p2 = scmp.lt.s32.totalorder %s1030_s20, 3 }
  0x2c   : > { %s253_s25 = sshll.u32 %s244_s24, 4  ;;  %s698_s1 = sshll.u32 %s1136_s5, 3  ;;  %s1183_s25 = int_to_ptr.vmem [resolvable:$true] %s253_s25 }
  0x2d   : > { %p1174_p3 = pnand %p706_p13, %p267_p2  ;;  %s699_s29 = sshll.u32 %s1026_s19, 7 }
  0x2e   : > { %s208_s12 = scalar_lea.hbm %s1334_s0, %s699_s29  ;;  %s202_s9 = scalar_lea.vmem [#allocation6], %s698_s1 }
  0x2f   : > { %s210_s14 = sshll.u32 %s202_s9, 4  ;;  %s199_s11 = scalar_lea.sflag [#allocation7], %s1136_s5  ;;  %s211_s14 = int_to_ptr.vmem [resolvable:$true] %s210_s14 }
  0x30   : > { %s903_s23 = scalar_lea.vmem %s211_s14, 128  ;;  %s1035_s7 = smov [#allocation6]  }
  0x31   : > { %p904_p4 = scmp.ne.s32.totalorder %s211_s14, %s903_s23  ;;  %s908_s24 = sshll.u32 %s1035_s7, 4  ;;  %s909_s24 = int_to_ptr.vmem [resolvable:$false] %s908_s24 }
  0x32   : > { %s910_s10 = scalar_lea.vmem %s909_s24, 256  ;;  %p911_p7 = scmp.lt.s32.totalorder %s211_s14, %s909_s24 }
  0x33   : > { %p906_p5 = pnand %p904_p4, %p864_p1  ;;  %p912_p10 = scmp.lt.s32.totalorder %s910_s10, %s903_s23 }
  0x35   : > { %p907_p6 = pneg %p906_p5  ;;  %p913_p13 = por %p912_p10, %p911_p7 }
  0x37   : > { %p914_p2 = pnand %p913_p13, %p907_p6 }
  0x39   : > { %917 = shalt.err (!%p914_p2)
}
  0x3a   : > { %787 = dma.hbm_to_vmem [thread:$0]  (!%p1142_p0), %s208_s12, 128, %s211_s14, %s199_s11  }
  0x3b   : > { %s931_s1 = scalar_lea.vmem %s1183_s25, 2048  ;;  %s1036_s17 = smov [#allocation11]  }
  0x3c   : > { %p932_p12 = scmp.ne.s32.totalorder %s1183_s25, %s931_s1  ;;  %s936_s29 = sshll.u32 %s1036_s17, 4  ;;  %s937_s29 = int_to_ptr.vmem [resolvable:$false] %s936_s29 }
  0x3d   : > { %s938_s30 = scalar_lea.vmem %s937_s29, 4096  ;;  %p939_p7 = scmp.lt.s32.totalorder %s1183_s25, %s937_s29 }
  0x3e   : > { %p934_p4 = pnand %p932_p12, %p864_p1  ;;  %p940_p6 = scmp.lt.s32.totalorder %s938_s30, %s931_s1 }
  0x40   : > { %p935_p5 = pneg %p934_p4  ;;  %p941_p10 = por %p940_p6, %p939_p7 }
  0x42   : > { %p942_p13 = pnand %p941_p10, %p935_p5 }
  0x44   : > { %945 = shalt.err (!%p942_p13)
}
  0x45   : > { %s1355_s5 = smov 128   ;;  %271 = sbr.rel (%p1174_p3) target bundleno = 922 (0x39a), region = 36 }
  0x46   : > { %793 = dma.hbm_to_vmem [thread:$0]  (!%p1142_p0), %s1168_s13, 2048, %s1183_s25, %s1152_s22, %s1355_s5, %s1355_s5, %s1034_s6  }
  0x47   : > { %s1208_s10 = sand.u32 (!%p1174_p3), 1, %s1014_s16  }
  0x48   : > { %s707_s12 = sshll.u32 (!%p1174_p3), %s1208_s10, 3  ;;  %s274_s9 = scalar_lea.sflag (!%p1174_p3), [#allocation7], %s1208_s10 }
  0x49   : > { %s277_s8 = scalar_lea.vmem (!%p1174_p3), [#allocation6], %s707_s12 }
  0x4a   : > { %997 = dma.done.wait (%p1118_p8), %s274_s9, 128  }
  0x4b   : > { %999 = vsyncadd (%p1118_p8), %s274_s9, 4294967168  ;;  %s282_s22 = sand.u32 1, %s1098_s21   ;;  %s708_s6 = sshll.u32 %s1208_s10, 7 }
  0x4c   : > { %s283_s13 = scalar_lea.sflag [#allocation10], %s282_s22  ;;  %s1222_s25 = scalar_lea.vmem [#allocation9], %s708_s6 }
  0x4d   : > { %1001 = dma.done.wait (%p1118_p8), %s283_s13, 4096  }
  0x4e   : > { %1003 = vsyncadd (%p1118_p8), %s283_s13, 4294963200  ;;  %v1037_v0 = vmov 0.0   ;;  %vm1038_vm0 = vmmov 0   ;;  %v366_v1 = vld [vmem:[%s1222_s25 + $0x70] sm:$0xff]  ;;  %v367_v2 = vld [vmem:[%s1222_s25 + $0x78] sm:$0xff]  ;;  %vm347_vm1 = vcmask 7168  }
  0x4f   : > { %736 = vmatprep.subr.bf16.mxu0 %v1037_v0  ;;  %752 = vmatprep.mubr.msk.bf16.mxu0 %vm1038_vm0, %v1037_v0  ;;  %v375_v3 = vpack.c.bf16 %v367_v2, %v366_v1  ;;  %v364_v4 = vld [vmem:[%s1222_s25 + $0x60] sm:$0xff]  ;;  %v365_v5 = vld [vmem:[%s1222_s25 + $0x68] sm:$0xff]  ;;  %v343_v6 = vld [vmem:[%s277_s8] sm:$0xff]  ;;  %v1039_v29 = vmov -1e+30   ;;  %349 = vst.msk [vmem:[#allocation4] sm:$0xff] %vm347_vm1, %v1037_v0 }
  0x50   : > { %756 = vmatprep.subr.bf16.mxu1 %v1037_v0  ;;  %772 = vmatprep.mubr.msk.bf16.mxu1 %vm1038_vm0, %v1037_v0  ;;  %v344_v7 = vmul.f32 0.17677669, %v343_v6  ;;  %v374_v8 = vpack.c.bf16 %v365_v5, %v364_v4  ;;  %v362_v10 = vld [vmem:[%s1222_s25 + $0x50] sm:$0xff]  ;;  %v363_v11 = vld [vmem:[%s1222_s25 + $0x58] sm:$0xff]  ;;  %v360_v13 = vld [vmem:[%s1222_s25 + $0x40] sm:$0xff]  ;;  %348 = vst.msk [vmem:[#allocation3] sm:$0xff] %vm347_vm1, %v1039_v29 }
  0x51   : > { %737 = vmatpush3.bf16.xpose.msra.mxu0 %v375_v3  ;;  %v373_v12 = vpack.c.bf16 %v363_v11, %v362_v10  ;;  %v361_v14 = vld [vmem:[%s1222_s25 + $0x48] sm:$0xff]  ;;  %v358_v16 = vld [vmem:[%s1222_s25 + $0x30] sm:$0xff]  ;;  %v359_v17 = vld [vmem:[%s1222_s25 + $0x38] sm:$0xff]  ;;  %p335_p8 = scmp.lt.s32.totalorder %s1022_s18, 1  ;;  %v1040_v36 = vmov 0   ;;  %s1265_s11 = scalar_lea.vmem [#allocation11], %s708_s6 }
  0x52   : > { %738 = vmatprep.subr.bf16.mxu0 %v1037_v0  ;;  %v345_v9 = vpack.c.bf16 %v344_v7, %v344_v7  ;;  %v372_v15 = vpack.c.bf16 %v361_v14, %v360_v13  ;;  %v371_v18 = vpack.c.bf16 %v359_v17, %v358_v16  ;;  %v356_v19 = vld [vmem:[%s1222_s25 + $0x20] sm:$0xff]  ;;  %v357_v20 = vld [vmem:[%s1222_s25 + $0x28] sm:$0xff]  ;;  %v354_v22 = vld [vmem:[%s1222_s25 + $0x10] sm:$0xff]  ;;  %854 = vset.pattern.permute.xlu0 %v1040_v36  ;;  %s713_s23 = sshll.u32 %s1022_s18, 7  ;;  %s332_s7 = scalar_lea.vmem [#allocation12], %s707_s12 }
  0x53   : > { %v370_v21 = vpack.c.bf16 %v357_v20, %v356_v19  ;;  %v355_v23 = vld [vmem:[%s1222_s25 + $0x18] sm:$0xff]  ;;  %v352_v25 = vld [vmem:[%s1222_s25] sm:$0xff]  ;;  %v353_v26 = vld [vmem:[%s1222_s25 + $0x8] sm:$0xff]  ;;  %s336_s21 = scalar_select %p335_p8, %s1022_s18, 1  ;;  %855 = vset.pattern.permute.xlu1 %v1040_v36 }
  0x54   : > { %346 = vst [vmem:[#allocation2] sm:$0xf] %v345_v9  ;;  %v369_v24 = vpack.c.bf16 %v355_v23, %v354_v22  ;;  %v368_v27 = vpack.c.bf16 %v353_v26, %v352_v25  ;;  %v471_v37 = vld [vmem:[%s1265_s11 + $0x70] sm:$0xff]  ;;  %v472_v38 = vld [vmem:[%s1265_s11 + $0x78] sm:$0xff]  ;;  %v469_v39 = vld [vmem:[%s1265_s11 + $0x60] sm:$0xff]  ;;  %s552_s24 = sshll.u32 %s332_s7, 4  ;;  %s550_s29 = scalar_lea.hbm %s1338_s4, %s713_s23  ;;  %s553_s24 = int_to_ptr.vmem [resolvable:$true] %s552_s24 }
  0x55   : > { %s337_s14 = scalar_lea.vmem %s1337_s3, %s336_s21  ;;  %v480_v40 = vpack.c.bf16 %v472_v38, %v471_v37  ;;  %v470_v41 = vld [vmem:[%s1265_s11 + $0x68] sm:$0xff]  ;;  %v467_v43 = vld [vmem:[%s1265_s11 + $0x50] sm:$0xff]  ;;  %v468_v44 = vld [vmem:[%s1265_s11 + $0x58] sm:$0xff]  ;;  %s538_s30 = scalar_lea.sflag [#allocation8], %s1208_s10 }
  0x56   : > { %v711_v30 = vld [vmem:[%s337_s14] ss:$0 sm:$0xff]  ;;  %v479_v42 = vpack.c.bf16 %v470_v41, %v469_v39  ;;  %v478_v45 = vpack.c.bf16 %v468_v44, %v467_v43  ;;  %v465_v46 = vld [vmem:[%s1265_s11 + $0x40] sm:$0xff]  ;;  %v466_v47 = vld [vmem:[%s1265_s11 + $0x48] sm:$0xff]  ;;  %s946_s5 = scalar_lea.vmem %s553_s24, 128  ;;  %s1041_s9 = smov [#allocation12]  }
  0x57   : > { %757 = vmatpush3.bf16.msra.mxu1 %v480_v40  ;;  %v427_v48 = vld [vmem:[#allocation3] sm:$0xff]  ;;  %v477_v49 = vpack.c.bf16 %v466_v47, %v465_v46  ;;  %v463_v52 = vld [vmem:[%s1265_s11 + $0x30] sm:$0xff]  ;;  %v464_v53 = vld [vmem:[%s1265_s11 + $0x38] sm:$0xff]  ;;  %p947_p12 = scmp.ne.s32.totalorder %s553_s24, %s946_s5  ;;  %s950_s18 = sshll.u32 %s1041_s9, 4  ;;  %s951_s18 = int_to_ptr.vmem [resolvable:$false] %s950_s18 }
  0x58   : > { %758 = vmatprep.subr.bf16.mxu1 %v1037_v0  ;;  %v476_v54 = vpack.c.bf16 %v464_v53, %v463_v52  ;;  %v461_v56 = vld [vmem:[%s1265_s11 + $0x20] sm:$0xff]  ;;  %v462_v57 = vld [vmem:[%s1265_s11 + $0x28] sm:$0xff]  ;;  %v459_v59 = vld [vmem:[%s1265_s11 + $0x10] sm:$0xff]  ;;  %s952_s12 = scalar_lea.vmem %s951_s18, 256  ;;  %p953_p3 = scmp.lt.s32.totalorder %s553_s24, %s951_s18 }
  0x59   : > { %739 = vmatpush3.bf16.xpose.msra.mxu0 %v374_v8  ;;  %v475_v58 = vpack.c.bf16 %v462_v57, %v461_v56  ;;  %v460_v60 = vld [vmem:[%s1265_s11 + $0x18] sm:$0xff]  ;;  %v457_v62 = vld [vmem:[%s1265_s11] sm:$0xff]  ;;  %v458_v63 = vld [vmem:[%s1265_s11 + $0x8] sm:$0xff]  ;;  %p948_p0 = pnand %p947_p12, %p1122_p9  ;;  %p954_p2 = scmp.lt.s32.totalorder %s952_s12, %s946_s5 }
  0x5a   : > { %740 = vmatprep.subr.bf16.mxu0 %v1037_v0  ;;  %v474_v61 = vpack.c.bf16 %v460_v60, %v459_v59  ;;  %v473_v1 = vpack.c.bf16 %v458_v63, %v457_v62  ;;  %v442_v9 = vld [vmem:[#allocation4] sm:$0xff] }
  0x5b   : > { %v351_v28 = vld [vmem:[#allocation2] sm:$0xf]  ;;  %759 = vmatpush3.bf16.msra.mxu1 %v479_v42  ;;  %p949_p1 = pneg %p948_p0  ;;  %p955_p4 = por %p954_p2, %p953_p3 }
  0x5c   : > { %760 = vmatprep.subr.bf16.mxu1 %v1037_v0 }
  0x5d   : > { %p956_p5 = pnand %p955_p4, %p949_p1 }
  0x5f   : > { %761 = vmatpush3.bf16.msra.mxu1 %v478_v45 }
  0x60   : > { %762 = vmatprep.subr.bf16.mxu1 %v1037_v0 }
  0x61   : > { %741 = vmatpush3.bf16.xpose.msra.mxu0 %v373_v12 }
  0x62   : > { %742 = vmatprep.subr.bf16.mxu0 %v1037_v0 }
  0x63   : > { %763 = vmatpush3.bf16.msra.mxu1 %v477_v49 }
  0x64   : > { %764 = vmatprep.subr.bf16.mxu1 %v1037_v0 }
  0x67   : > { %765 = vmatpush3.bf16.msra.mxu1 %v476_v54 }
  0x68   : > { %766 = vmatprep.subr.bf16.mxu1 %v1037_v0 }
  0x69   : > { %743 = vmatpush3.bf16.xpose.msra.mxu0 %v372_v15 }
  0x6a   : > { %744 = vmatprep.subr.bf16.mxu0 %v1037_v0 }
  0x6b   : > { %767 = vmatpush3.bf16.msra.mxu1 %v475_v58 }
  0x6c   : > { %768 = vmatprep.subr.bf16.mxu1 %v1037_v0 }
  0x6f   : > { %769 = vmatpush3.bf16.msra.mxu1 %v474_v61 }
  0x70   : > { %770 = vmatprep.subr.bf16.mxu1 %v1037_v0 }
  0x71   : > { %745 = vmatpush3.bf16.xpose.msra.mxu0 %v371_v18 }
  0x72   : > { %746 = vmatprep.subr.bf16.mxu0 %v1037_v0 }
  0x73   : > { %771 = vmatpush3.bf16.msra.mxu1 %v473_v1 }
  0x79   : > { %747 = vmatpush3.bf16.xpose.msra.mxu0 %v370_v21 }
  0x7a   : > { %748 = vmatprep.subr.bf16.mxu0 %v1037_v0 }
  0x81   : > { %749 = vmatpush3.bf16.xpose.msra.mxu0 %v369_v24 }
  0x82   : > { %750 = vmatprep.subr.bf16.mxu0 %v1037_v0 }
  0x89   : > { %751 = vmatpush3.bf16.xpose.msra.mxu0 %v368_v27 }
  0x90   : > { %753 = vmatmul.mubr.bf16.vlgmr.msra.gmra.mxu0 %v351_v28 }
 0x150   : > { %v421_v31 = vpop.f32.mrf.mxu0 }
 0x151   : > { %v422_v32 = vadd.f32 %v711_v30, %v421_v31 }
 0x152   : > { %v754_v33 = vpop.f32.mrf.mxu0 }
 0x153   : > { %428 = vmax.xlane.f32.xlu0 %v422_v32 }
 0x154   : > { %v424_v34 = vpop.f32.mrf.mxu0 }
 0x156   : > { %v755_v35 = vpop.f32.mrf.mxu0 }
 0x1dc   : > { %v429_v50 = vpop.xlane.xlu0 %428 }
 0x1dd   : > { %v430_v51 = vmax.f32 %v427_v48, %v429_v50 }
 0x1df   : > { %v431_v55 = vsub.f32 %v427_v48, %v430_v51  ;;  %523 = vst.msk [vmem:[#allocation3] sm:$0xff] %vm347_vm1, %v430_v51  ;;  %436 = vperm.xlu0 %854, %v430_v51  }
 0x1e1   : > { %v432_v6 = vmul.f32 1.442695, %v431_v55 }
 0x25a   : > { %v437_v2 = vpop.permute.xlu0 %436 }
 0x25b   : > { %v439_v3 = vsub.f32 %v422_v32, %v437_v2 }
 0x25d   : > { %v440_v4 = vmul.f32 1.442695, %v439_v3 }
 0x25f   : > { %856 = vpow2.f32 %v440_v4 }
 0x260   : > { %858 = vpow2.f32 %v432_v6 }
 0x26c   : > { %v857_v5 = vpop.eup %856 }
 0x26d   : > { %444 = vadd.xlane.f32.xlu1 %v857_v5  ;;  %v456_v7 = vpack.c.bf16 %v857_v5, %v857_v5  ;;  %v859_v8 = vpop.eup %858 }
 0x26e   : > { %v443_v10 = vmul.f32 %v859_v8, %v442_v9 }
 0x26f   : > { %773 = vmatmul.mubr.bf16.vlgmr.msra.gmra.mxu1 %v456_v7 }
 0x27e   : > { %452 = vperm.xlu1 %855, %v859_v8  }
 0x2f6   : > { %v445_v11 = vpop.xlane.xlu1 %444 }
 0x2f7   : > { %v446_v12 = vadd.f32 %v445_v11, %v443_v10 }
 0x2f9   : > { %448 = vst.msk [vmem:[#allocation4] sm:$0xff] %vm347_vm1, %v446_v12 }
 0x2fa   : > { %v453_v18 = vpop.permute.xlu1 %452 }
 0x2fb   : > { %v455_v19 = vmul.f32 0.0, %v453_v18 }
 0x300   : > { %v527_v0 = vld [vmem:[#allocation4] sm:$0xff] }
 0x301   : > { %860 = vrcp.f32 %v527_v0 }
 0x30e   : > { %v861_v13 = vpop.eup %860 }
 0x30f   : > { %532 = vperm.xlu1 %855, %v861_v13  }
 0x32f   : > { %v515_v14 = vpop.f32.mrf.mxu1 }
 0x330   : > { %v521_v20 = vadd.f32 %v515_v14, %v455_v19 }
 0x331   : > { %v774_v15 = vpop.f32.mrf.mxu1 }
 0x333   : > { %v518_v16 = vpop.f32.mrf.mxu1 }
 0x335   : > { %v775_v17 = vpop.f32.mrf.mxu1 }
 0x38a   : > { %v533_v21 = vpop.permute.xlu1 %532 }
 0x38b   : > { %v535_v22 = vmul.f32 %v533_v21, %v521_v20 }
 0x38d   : > { %536 = vst [vmem:[%s332_s7] sm:$0xff] %v535_v22 }
 0x38e   : > { %959 = shalt.err (!%p956_p5)
}
 0x38f   : > { %s960_s8 = scalar_lea.hbm %s550_s29, 128  ;;  %s964_s6 = scalar_lea.hbm %s1338_s4, 256 }
 0x390   : > { %p961_p7 = scmp.ne.s32.totalorder %s550_s29, %s960_s8  ;;  %p965_p13 = scmp.lt.s32.totalorder %s550_s29, %s1338_s4 }
 0x391   : > { %p966_p8 = scmp.lt.s32.totalorder %s964_s6, %s960_s8 }
 0x392   : > { %p962_p6 = pnand %p961_p7, %p1122_p9 }
 0x393   : > { %p967_p12 = por %p966_p8, %p965_p13 }
 0x394   : > { %p963_p10 = pneg %p962_p6 }
 0x396   : > { %p968_p0 = pnand %p967_p12, %p963_p10 }
 0x398   : > { %971 = shalt.err (!%p968_p0)
}
 0x399   : > { %782 = dma.vmem_to_hbm [thread:$0]  (%p1122_p9), %s553_s24, 128, %s550_s29, %s538_s30  }
 0x39a PF: > { %s564_s27 = sand.u32 1, %s1010_s15   ;;  %p1357_p1 = scmp.ge.s32.totalorder %s1030_s20, 2 }
 0x39b   : > { %s565_s26 = scalar_lea.sflag [#allocation8], %s564_s27 }
 0x39c   : > { %p795_p3 = pnand %p1357_p1, %p1129_p11 }
 0x39e   : > { %p796_p2 = pneg %p795_p3 }
 0x3a0   : > { %1005 = dma.done.wait (%p796_p2), %s565_s26, 128  }
 0x3a1   : > { %1007 = vsyncadd (%p796_p2), %s565_s26, 4294967168  ;;  %s23_s20 = sadd.s32 1, %s1030_s20   ;;  %s1358_s14 = sld [smem:[#allocation16_spill]] }
 0x3a2   : > { %p20_p4 = scmp.ge.s32.totalorder %s23_s20, 4   ;;  %s1359_s17 = sld [smem:[#allocation18_spill]] }
 0x3a3   : > { %s1360_s28 = sld [smem:[#allocation17_spill]]  ;;  %s1361_s15 = smov %s1014_s16 }
 0x3a4   : > { %s1363_s18 = smov %s1026_s19 }
 0x3a5   :  { %22 = sbr.rel (!%p20_p4) target bundleno = 10 (0xa), region = 117 }
 0x3a7   : > { %s1362_s16 = smov %s1358_s14 }
 0x3a9   : > { %s1364_s19 = smov %s1360_s28 }
 0x3aa   :  { %570 = vsyncpa [#allocation7], 1 }
 0x3ab   :  { %572 = vsyncpa [#allocation7 + $0x1], 1 }
 0x3ac   :  { %573 = vsyncpa [#allocation10], 1 }
 0x3ad   :  { %575 = vsyncpa [#allocation10 + $0x1], 1 }
 0x3ae   :  { %576 = vsyncpa [#allocation8], 1 }
 0x3af   :  { %578 = vsyncpa [#allocation8 + $0x1], 1 }

</bundles_post_ra>
